<compile_context>
chip_gen: v5e
topology: v5e:2x2
jax: 0.10.0
libtpu: 0.0.40
codegen_flags: <defaults>
</compile_context>

<pallas_src>
import functools

import jax
import jax.numpy as jnp
from jax.experimental import pallas as pl
from jax.experimental.pallas import tpu as pltpu

_LANE = 128
_SUBLANE = 8


def _vmem_budget():
    """Returns (target block bytes, max single-pass block bytes, vmem_limit_bytes)."""
    try:
        vmem = pltpu.get_tpu_info().vmem_capacity_bytes
    except Exception:  # no / unknown TPU info -> assume the smallest VMEM (v7x: 64 MiB/TC)
        vmem = 64 * 1024 * 1024
    if vmem >= 128 * 1024 * 1024:          # v5e / v6e
        target, limit = 8 * 1024 * 1024, 96 * 1024 * 1024
    else:                                  # v7x (64 MiB per TensorCore)
        target, limit = 4 * 1024 * 1024, 48 * 1024 * 1024
    # ~6x block bytes live at once: 2x double-buffered input, 2x output, ~2x f32 temps.
    return target, limit // 6, limit


def _pick_batch_block(batch, row_bytes, target_bytes, max_block_bytes):
    """Rows per block for the single-pass kernel, or None -> use the two-pass path.

    Block second-to-last dim must be a multiple of 8 or equal the full batch dim;
    partial trailing blocks are fine (per-sample rows are independent).
    """
    min_tb = batch if batch <= _SUBLANE else _SUBLANE
    if min_tb * max(row_bytes, 1) > max_block_bytes:
        return None
    if batch <= _SUBLANE:
        return batch
    fit = max(_SUBLANE, (target_bytes // max(row_bytes, 1)) // _SUBLANE * _SUBLANE)
    # Keep >= ~8 grid steps when the batch allows (v7x: 2 cores x >= 4 pipelined steps).
    want = max(_SUBLANE, (batch // 8) // _SUBLANE * _SUBLANE)
    return min(fit, want)


def _pick_lane_block(batch, n, itemsize, target_bytes):
    """(TB, TN) for the two-pass path: TB sublane-legal, TN a multiple of 128."""
    tb = batch if batch <= _SUBLANE else _SUBLANE
    tn = max(_LANE, (target_bytes // max(tb * itemsize, 1)) // _LANE * _LANE)
    tn = min(tn, pl.cdiv(n, _LANE) * _LANE)
    return tb, tn


def _fused_kernel(params_ref, x_ref, o_ref):
    # x_ref block: (TB, N) -- TB whole samples, lane-dense along the flattened sample.
    mean_t = params_ref[0]
    std_t = params_ref[1]
    min_v = params_ref[2]
    max_v = params_ref[3]

    x = x_ref[...].astype(jnp.float32)
    n = x.shape[-1]
    mu = jnp.sum(x, axis=-1, keepdims=True) / n
    d = x - mu                                    # reused for the variance AND the output
    var = jnp.sum(d * d, axis=-1, keepdims=True) / (n - 1)   # unbiased (torch default)
    gain = std_t * jax.lax.rsqrt(var)
    o_ref[...] = jnp.clip(gain * d + gain * mean_t, min_v, max_v).astype(o_ref.dtype)


def _reduce_kernel(x_ref, sum_ref, sq_ref, *, n_valid, tn, needs_mask):
    s = pl.program_id(1)

    @pl.when(s == 0)
    def _():
        sum_ref[...] = jnp.zeros_like(sum_ref)
        sq_ref[...] = jnp.zeros_like(sq_ref)

    x = x_ref[...].astype(jnp.float32)
    if needs_mask:  # static: only when N is not a multiple of TN
        col = s * tn + jax.lax.broadcasted_iota(jnp.int32, x.shape, 1)
        x = jnp.where(col < n_valid, x, 0.0)      # integer compare: exact for any N
    sum_ref[...] += jnp.sum(x, axis=-1, keepdims=True)
    sq_ref[...] += jnp.sum(x * x, axis=-1, keepdims=True)


def _apply_kernel(params_ref, scale_ref, shift_ref, x_ref, o_ref):
    min_v = params_ref[2]
    max_v = params_ref[3]
    x = x_ref[...].astype(jnp.float32)
    y = scale_ref[...] * x + shift_ref[...]
    o_ref[...] = jnp.clip(y, min_v, max_v).astype(o_ref.dtype)


@functools.partial(jax.jit, static_argnames=("block_target_bytes",))
def normalize_clamp(x, mean=0.0, std=0.1, min_val=-10.0, max_val=10.0,
                    block_target_bytes=None):
    """x: (B, C, H, W). Per-sample normalize over dims [1,2,3], then clamp."""
    B, C, H, W = x.shape
    N = C * H * W
    itemsize = jnp.dtype(x.dtype).itemsize
    row_bytes = N * itemsize

    target, max_block, vmem_limit = _vmem_budget()
    if block_target_bytes is not None:           # test / tuning hook
        target = int(block_target_bytes)
        max_block = target

    params = jnp.stack([
        jnp.asarray(mean, jnp.float32), jnp.asarray(std, jnp.float32),
        jnp.asarray(min_val, jnp.float32), jnp.asarray(max_val, jnp.float32)])
    smem_spec = pl.BlockSpec(memory_space=pltpu.MemorySpace.SMEM)

    x2d = x.reshape(B, N)                        # free view; no pad, no copy

    tb = _pick_batch_block(B, row_bytes, target, max_block)
    if tb is not None:
        # ---- Path A: single pass (x read once, y written once). ----
        out2d = pl.pallas_call(
            _fused_kernel,
            out_shape=jax.ShapeDtypeStruct((B, N), x.dtype),
            grid=(pl.cdiv(B, tb),),
            in_specs=[smem_spec,
                      pl.BlockSpec((tb, N), lambda b: (b, 0))],
            out_specs=pl.BlockSpec((tb, N), lambda b: (b, 0)),
            compiler_params=pltpu.CompilerParams(
                dimension_semantics=("parallel",),
                vmem_limit_bytes=vmem_limit),
        )(params, x2d)
    else:
        # ---- Path B: samples too large for one VMEM block (v7x 64 MiB budget).
        # Pass 1: per-sample sum / sum-of-squares with resident (TB, 1) accumulators.
        tb, tn = _pick_lane_block(B, N, itemsize, target)
        grid = (pl.cdiv(B, tb), pl.cdiv(N, tn))
        sums, sqs = pl.pallas_call(
            functools.partial(_reduce_kernel, n_valid=N, tn=tn,
                              needs_mask=(N % tn) != 0),
            out_shape=(jax.ShapeDtypeStruct((B, 1), jnp.float32),
                       jax.ShapeDtypeStruct((B, 1), jnp.float32)),
            grid=grid,
            in_specs=[pl.BlockSpec((tb, tn), lambda b, s: (b, s))],
            out_specs=(pl.BlockSpec((tb, 1), lambda b, s: (b, 0)),
                       pl.BlockSpec((tb, 1), lambda b, s: (b, 0))),
            compiler_params=pltpu.CompilerParams(
                dimension_semantics=("parallel", "arbitrary"),
                vmem_limit_bytes=vmem_limit),
        )(x2d)

        n_f = jnp.float32(N)
        mu = sums / n_f
        # TODO(synk): sum-of-squares variance is less stable than Path A's centered
        # two-pass formula; acceptable for typical image data.
        var = (sqs - n_f * mu * mu) / (N - 1)
        gain = jnp.asarray(std, jnp.float32) * jax.lax.rsqrt(var)
        scale = gain                                              # y = scale*x + shift
        shift = gain * (jnp.asarray(mean, jnp.float32) - mu)

        # Pass 2: stream x again, apply the per-sample affine + clamp.
        out2d = pl.pallas_call(
            _apply_kernel,
            out_shape=jax.ShapeDtypeStruct((B, N), x.dtype),
            grid=grid,
            in_specs=[smem_spec,
                      pl.BlockSpec((tb, 1), lambda b, s: (b, 0)),
                      pl.BlockSpec((tb, 1), lambda b, s: (b, 0)),
                      pl.BlockSpec((tb, tn), lambda b, s: (b, s))],
            out_specs=pl.BlockSpec((tb, tn), lambda b, s: (b, s)),
            compiler_params=pltpu.CompilerParams(
                dimension_semantics=("parallel", "parallel"),
                vmem_limit_bytes=vmem_limit),
        )(params, scale, shift, x2d)

    return out2d.reshape(B, C, H, W)


def _reference(x, mean, std, min_v, max_v):
    dims = (1, 2, 3)
    n = x.shape[1] * x.shape[2] * x.shape[3]
    mu = x.mean(axis=dims, keepdims=True)
    xs = x + (mean - mu)
    var = ((xs - xs.mean(axis=dims, keepdims=True)) ** 2).sum(axis=dims, keepdims=True) / (n - 1)
    return jnp.clip((std / jnp.sqrt(var)) * xs, min_v, max_v)


if __name__ == "__main__":
    key = jax.random.PRNGKey(0)
    k1, k2 = jax.random.split(key)

    # Test 1: small NCHW input, single-pass path (Path A).
    B, C, H, W = 2, 4, 16, 16
    x = jax.random.normal(k1, (B, C, H, W), dtype=jnp.float32) * 3.0 + 1.5
    out = jax.block_until_ready(normalize_clamp(x, mean=0.0, std=0.1,
                                                min_val=-10.0, max_val=10.0))
    ref = _reference(x, 0.0, 0.1, -10.0, 10.0)
    assert out.shape == x.shape and out.dtype == x.dtype
    assert jnp.allclose(out, ref, atol=1e-5, rtol=1e-5), float(jnp.max(jnp.abs(out - ref)))

    # Test 2: ragged N, tiny forced block budget exercises the two-pass path (Path B),
    # with clamp bounds that actually clip.
    B2, C2, H2, W2 = 3, 3, 17, 19
    x2 = jax.random.normal(k2, (B2, C2, H2, W2), dtype=jnp.float32) * 2.0 - 0.5
    out2 = jax.block_until_ready(normalize_clamp(x2, mean=0.0, std=0.1,
                                                 min_val=-0.15, max_val=0.1,
                                                 block_target_bytes=2048))
    ref2 = _reference(x2, 0.0, 0.1, -0.15, 0.1)
    assert out2.shape == x2.shape and out2.dtype == x2.dtype
    assert jnp.allclose(out2, ref2, atol=1e-4, rtol=1e-4), float(jnp.max(jnp.abs(out2 - ref2)))

    print("KERNEL_OK")
</pallas_src>

<mosaic_0001>
module attributes {stable_mosaic.version = 11 : i64} {
  func.func @_fused_kernel(%arg0: i32, %arg1: memref<4xf32, #tpu.memory_space<smem>>, %arg2: memref<2x1024xf32, #tpu.memory_space<vmem>>, %arg3: memref<2x1024xf32, #tpu.memory_space<vmem>>) attributes {dimension_semantics = [#tpu.dimension_semantics<parallel>], iteration_bounds = array<i64: 1>, scalar_prefetch = 0 : i64, scratch_operands = 0 : i64, tpu.core_type = #tpu.core_type<tc>, window_params = [{transform_indices = @transform_0, window_bounds = array<i64: 4>}, {transform_indices = @transform_1, window_bounds = array<i64: 2, 1024>}, {transform_indices = @transform_2, window_bounds = array<i64: 2, 1024>}]} {
    %c0 = arith.constant 0 : index
    %0 = memref.load %arg1[%c0] : memref<4xf32, #tpu.memory_space<smem>>
    %c1 = arith.constant 1 : index
    %1 = memref.load %arg1[%c1] : memref<4xf32, #tpu.memory_space<smem>>
    %c2 = arith.constant 2 : index
    %2 = memref.load %arg1[%c2] : memref<4xf32, #tpu.memory_space<smem>>
    %c3 = arith.constant 3 : index
    %3 = memref.load %arg1[%c3] : memref<4xf32, #tpu.memory_space<smem>>
    %c0_0 = arith.constant 0 : index
    %c0_1 = arith.constant 0 : index
    %4 = vector.load %arg2[%c0_0, %c0_1] : memref<2x1024xf32, #tpu.memory_space<vmem>>, vector<2x1024xf32>
    %cst = arith.constant dense<0.000000e+00> : vector<2xf32>
    %5 = vector.multi_reduction <add>, %4, %cst [1] : vector<2x1024xf32> to vector<2xf32>
    %6 = vector.shape_cast %5 : vector<2xf32> to vector<2x1xf32>
    %cst_2 = arith.constant 1.024000e+03 : f32
    %7 = vector.broadcast %cst_2 : f32 to vector<2x1xf32>
    %8 = arith.divf %6, %7 : vector<2x1xf32>
    %9 = vector.broadcast %8 : vector<2x1xf32> to vector<2x1024xf32>
    %10 = arith.subf %4, %9 : vector<2x1024xf32>
    %11 = arith.mulf %10, %10 : vector<2x1024xf32>
    %cst_3 = arith.constant dense<0.000000e+00> : vector<2xf32>
    %12 = vector.multi_reduction <add>, %11, %cst_3 [1] : vector<2x1024xf32> to vector<2xf32>
    %13 = vector.shape_cast %12 : vector<2xf32> to vector<2x1xf32>
    %cst_4 = arith.constant 1.023000e+03 : f32
    %14 = vector.broadcast %cst_4 : f32 to vector<2x1xf32>
    %15 = arith.divf %13, %14 : vector<2x1xf32>
    %16 = math.rsqrt %15 : vector<2x1xf32>
    %17 = vector.broadcast %1 : f32 to vector<2x1xf32>
    %18 = arith.mulf %17, %16 : vector<2x1xf32>
    %19 = vector.broadcast %18 : vector<2x1xf32> to vector<2x1024xf32>
    %20 = arith.mulf %19, %10 : vector<2x1024xf32>
    %21 = vector.broadcast %0 : f32 to vector<2x1xf32>
    %22 = arith.mulf %18, %21 : vector<2x1xf32>
    %23 = vector.broadcast %22 : vector<2x1xf32> to vector<2x1024xf32>
    %24 = arith.addf %20, %23 : vector<2x1024xf32>
    %25 = vector.broadcast %2 : f32 to vector<2x1024xf32>
    %26 = arith.maximumf %25, %24 : vector<2x1024xf32>
    %27 = vector.broadcast %3 : f32 to vector<2x1024xf32>
    %28 = arith.minimumf %27, %26 : vector<2x1024xf32>
    %c0_5 = arith.constant 0 : index
    %c0_6 = arith.constant 0 : index
    %29 = vector.load %arg3[%c0_5, %c0_6] : memref<2x1024xf32, #tpu.memory_space<vmem>>, vector<2x1024xf32>
    tpu.vector_store %arg3[%c0_5, %c0_6], %28 {strides = array<i32>} : memref<2x1024xf32, #tpu.memory_space<vmem>>, vector<2x1024xf32>,
    return
  }
  func.func @transform_0(%arg0: i32) -> i32 {
    %c0_i32 = arith.constant 0 : i32
    %c0_i32_0 = arith.constant 0 : i32
    return %c0_i32 : i32
  }
  func.func @transform_1(%arg0: i32) -> (i32, i32) {
    %c0_i32 = arith.constant 0 : i32
    %c0_i32_0 = arith.constant 0 : i32
    return %arg0, %c0_i32 : i32, i32
  }
  func.func @transform_2(%arg0: i32) -> (i32, i32) {
    %c0_i32 = arith.constant 0 : i32
    %c0_i32_0 = arith.constant 0 : i32
    return %arg0, %c0_i32 : i32, i32
  }
}

</mosaic_0001>

<bundles_post_ra>
// kernel: normalize_clamp.1
= control target key start
LH: loop header
LB: loop body
LE: loop exit
PB: predicated region body
PF: predicated region fallthrough
CT: control target
= control target key end

     0   :  { %7 = vsyncpa [#allocation3], 0  ;;  %s260_s12 = smov [#allocation2]   ;;  %s316_s0 = inlined_call_operand.vmem [shape: f32[4], index: 0, kind: input, shape index: {}]   ;;  %s317_s1 = inlined_call_operand.vmem [shape: f32[2,1024], index: 1, kind: input, shape index: {}]   ;;  %s318_s2 = inlined_call_operand.vmem [shape: f32[2,1024], index: 2, kind: output, shape index: {}]  }
   0x1   :  { %s13_s11 = sshll.u32 %s316_s0, 4  ;;  %s14_s11 = int_to_ptr.vmem [resolvable:$true] %s13_s11 }
   0x2   :  { %16 = dma.vmem_to_smem %s14_s11, 16, %s260_s12, [#allocation3]  }
   0x3   :  { %258 = dma.done.wait [#allocation3], 16  }
   0x4   :  { %259 = vsyncadd [#allocation3], 4294967280 }
   0x5   :  { %23 = sfence }
   0x6   :  { %v28_v0 = vld [vmem:[%s317_s1] sm:$0xff]  ;;  %v29_v1 = vld [vmem:[%s317_s1 + $0x8] sm:$0xff]  ;;  %vm51_vm0 = vcmask 1041408   ;;  %v261_v25 = vmov 1024.0   ;;  %v262_v31 = vmov 269488144  }
   0x7   :  { %32 = vst [vmem:[#allocation1] ss:$4 sm:$0xff] %v28_v0  ;;  %240 = vrcp.f32 %v261_v25  ;;  %v79_v32 = vunpack.c.l.s4 %v262_v31  ;;  %s233_s0 = sld [smem:[#allocation2 + $0x1]]  ;;  %vm217_vm6 = vcmask 1045508   ;;  %vm219_vm7 = vcmask 1043456  }
   0x8   :  { %34 = vst [vmem:[#allocation1 + $0x20] ss:$4 sm:$0xff] %v29_v1  ;;  %s24_s1 = sld [smem:[#allocation2]] }
   0x9   :  { %v80_v34 = vunpack.c.0.s8 %v79_v32  ;;  %s234_s17 = sld [smem:[#allocation2 + $0x2]] }
   0xa   :  { %s235_s18 = sld [smem:[#allocation2 + $0x3]] }
   0xd   :  { %v241_v26 = vpop.eup %240 }
   0xe   :  { %v35_v2 = vld.sshfl [vmem:[#allocation1] sm:$0xff pattern:$0x73625140]  ;;  %v36_v3 = vld.sshfl [vmem:[#allocation1 + $0x8] sm:$0xff pattern:$0x73625140]  ;;  %vm74_vm1 = vweird.f32 %v241_v26  ;;  %v174_v25 = vstv %s24_s1 }
   0xf   :  { %v37_v4 = vld.sshfl [vmem:[#allocation1 + $0x10] sm:$0xff pattern:$0x73625140]  ;;  %v38_v5 = vld.sshfl [vmem:[#allocation1 + $0x18] sm:$0xff pattern:$0x73625140] }
  0x10   :  { %v52_v6 = vsel %vm51_vm0, %v35_v2, 0.0  ;;  %v53_v7 = vsel %vm51_vm0, %v36_v3, 0.0  ;;  %v55_v8 = vsel %vm51_vm0, %v37_v4, 0.0  ;;  %v39_v9 = vld.sshfl [vmem:[#allocation1 + $0x20] sm:$0xff pattern:$0x73625140] }
  0x11   :  { %v54_v10 = vadd.f32 %v53_v7, %v52_v6  ;;  %v57_v11 = vsel %vm51_vm0, %v38_v5, 0.0  ;;  %v40_v12 = vld.sshfl [vmem:[#allocation1 + $0x28] sm:$0xff pattern:$0x73625140]  ;;  %v59_v14 = vsel %vm51_vm0, %v39_v9, 0.0  ;;  %v70_v27 = vmul.f32 1024.0, %v241_v26 }
  0x12   :  { %v41_v15 = vld.sshfl [vmem:[#allocation1 + $0x30] sm:$0xff pattern:$0x73625140]  ;;  %v61_v17 = vsel %vm51_vm0, %v40_v12, 0.0 }
  0x13   :  { %v56_v13 = vadd.f32 %v55_v8, %v54_v10  ;;  %v42_v18 = vld.sshfl [vmem:[#allocation1 + $0x38] sm:$0xff pattern:$0x73625140]  ;;  %v63_v20 = vsel %vm51_vm0, %v41_v15, 0.0  ;;  %v71_v28 = vsub.f32 1.0, %v70_v27 }
  0x14   :  { %v65_v22 = vsel %vm51_vm0, %v42_v18, 0.0 }
  0x15   :  { %v58_v16 = vadd.f32 %v57_v11, %v56_v13  ;;  %v72_v29 = vmul.f32 %v241_v26, %v71_v28 }
  0x17   :  { %v60_v19 = vadd.f32 %v59_v14, %v58_v16  ;;  %v73_v30 = vadd.f32 %v241_v26, %v72_v29  ;;  %v143_v16 = vstv %s233_s0 }
  0x19   :  { %v62_v21 = vadd.f32 %v61_v17, %v60_v19  ;;  %v75_v33 = vsel %vm74_vm1, %v241_v26, %v73_v30 }
  0x1b   :  { %v64_v23 = vadd.f32 %v63_v20, %v62_v21 }
  0x1d   :  { %v66_v24 = vadd.f32 %v65_v22, %v64_v23 }
  0x1f   :  { %67 = vadd.xlane.f32.xlu0 %v66_v24 }
  0x92   :  { %v68_v35 = vpop.xlane.xlu0 %67 }
  0x93   :  { %v76_v36 = vmul.f32 %v75_v33, %v68_v35 }
  0x95   :  { %v81_v37 = vperm.slane %v76_v36, %v80_v34 }
  0x97   :  { %v83_v38 = vsub.f32 %v28_v0, %v81_v37  ;;  %v84_v39 = vsub.f32 %v29_v1, %v81_v37  ;;  %v263_v1 = vmov 1023.0   ;;  %v184_v37 = vstv %s234_s17 }
  0x98   :  { %242 = vrcp.f32 %v263_v1 }
  0x99   :  { %v85_v40 = vmul.f32 %v83_v38, %v83_v38  ;;  %v86_v41 = vmul.f32 %v84_v39, %v84_v39 }
  0x9b   :  { %89 = vst [vmem:[#allocation1] ss:$4 sm:$0xff] %v85_v40 }
  0x9c   :  { %91 = vst [vmem:[#allocation1 + $0x20] ss:$4 sm:$0xff] %v86_v41 }
  0x9e   :  { %v243_v2 = vpop.eup %242 }
  0x9f   :  { %v126_v3 = vmul.f32 1023.0, %v243_v2  ;;  %vm130_vm2 = vweird.f32 %v243_v2 }
  0xa1   :  { %v127_v4 = vsub.f32 1.0, %v126_v3 }
  0xa2   :  { %v92_v42 = vld.sshfl [vmem:[#allocation1] sm:$0xff pattern:$0x73625140]  ;;  %v93_v43 = vld.sshfl [vmem:[#allocation1 + $0x8] sm:$0xff pattern:$0x73625140] }
  0xa3   :  { %v94_v44 = vld.sshfl [vmem:[#allocation1 + $0x10] sm:$0xff pattern:$0x73625140]  ;;  %v95_v45 = vld.sshfl [vmem:[#allocation1 + $0x18] sm:$0xff pattern:$0x73625140]  ;;  %v128_v5 = vmul.f32 %v243_v2, %v127_v4 }
  0xa4   :  { %v96_v46 = vld.sshfl [vmem:[#allocation1 + $0x20] sm:$0xff pattern:$0x73625140]  ;;  %v97_v47 = vld.sshfl [vmem:[#allocation1 + $0x28] sm:$0xff pattern:$0x73625140] }
  0xa5   :  { %v98_v48 = vld.sshfl [vmem:[#allocation1 + $0x30] sm:$0xff pattern:$0x73625140]  ;;  %v99_v49 = vld.sshfl [vmem:[#allocation1 + $0x38] sm:$0xff pattern:$0x73625140]  ;;  %v129_v6 = vadd.f32 %v243_v2, %v128_v5 }
  0xa6   :  { %v108_v50 = vsel %vm51_vm0, %v92_v42, 0.0  ;;  %v109_v51 = vsel %vm51_vm0, %v93_v43, 0.0  ;;  %147 = vst [vmem:[#allocation1] ss:$4 sm:$0xff] %v83_v38  ;;  %v111_v53 = vsel %vm51_vm0, %v94_v44, 0.0  ;;  %v113_v55 = vsel %vm51_vm0, %v95_v45, 0.0 }
  0xa7   :  { %v110_v52 = vadd.f32 %v109_v51, %v108_v50  ;;  %149 = vst [vmem:[#allocation1 + $0x20] ss:$4 sm:$0xff] %v84_v39  ;;  %v115_v57 = vsel %vm51_vm0, %v96_v46, 0.0  ;;  %v117_v59 = vsel %vm51_vm0, %v97_v47, 0.0  ;;  %v119_v61 = vsel %vm51_vm0, %v98_v48, 0.0 }
  0xa8   :  { %v121_v63 = vsel %vm51_vm0, %v99_v49, 0.0  ;;  %v131_v7 = vsel %vm130_vm2, %v243_v2, %v129_v6  ;;  %v193_v38 = vstv %s235_s18 }
  0xa9   :  { %v112_v54 = vadd.f32 %v111_v53, %v110_v52 }
  0xab   :  { %v114_v56 = vadd.f32 %v113_v55, %v112_v54 }
  0xad   :  { %v116_v58 = vadd.f32 %v115_v57, %v114_v56  ;;  %v150_v17 = vld.sshfl [vmem:[#allocation1] sm:$0xff pattern:$0x73625140]  ;;  %v151_v18 = vld.sshfl [vmem:[#allocation1 + $0x8] sm:$0xff pattern:$0x73625140] }
  0xae   :  { %v152_v20 = vld.sshfl [vmem:[#allocation1 + $0x10] sm:$0xff pattern:$0x73625140]  ;;  %v153_v21 = vld.sshfl [vmem:[#allocation1 + $0x18] sm:$0xff pattern:$0x73625140] }
  0xaf   :  { %v118_v60 = vadd.f32 %v117_v59, %v116_v58  ;;  %v154_v23 = vld.sshfl [vmem:[#allocation1 + $0x20] sm:$0xff pattern:$0x73625140]  ;;  %v155_v24 = vld.sshfl [vmem:[#allocation1 + $0x28] sm:$0xff pattern:$0x73625140] }
  0xb0   :  { %v156_v26 = vld.sshfl [vmem:[#allocation1 + $0x30] sm:$0xff pattern:$0x73625140]  ;;  %v157_v27 = vld.sshfl [vmem:[#allocation1 + $0x38] sm:$0xff pattern:$0x73625140] }
  0xb1   :  { %v120_v62 = vadd.f32 %v119_v61, %v118_v60 }
  0xb3   :  { %v122_v0 = vadd.f32 %v121_v63, %v120_v62 }
  0xb5   :  { %123 = vadd.xlane.f32.xlu0 %v122_v0 }
 0x128   :  { %v124_v8 = vpop.xlane.xlu0 %123 }
 0x129   :  { %v132_v9 = vmul.f32 %v131_v7, %v124_v8 }
 0x12b   :  { %244 = vrsqrt.f32 %v132_v9  ;;  %vm139_vm4 = vweird.f32 %v132_v9 }
 0x131   :  { %v245_v10 = vpop.eup %244 }
 0x132   :  { %v134_v11 = vmul.f32 %v245_v10, %v132_v9  ;;  %vm140_vm3 = vweird.f32 %v245_v10 }
 0x133   :  { %vm141_vm5 = vmor %vm139_vm4, %vm140_vm3 }
 0x134   :  { %v135_v12 = vmul.f32 %v245_v10, %v134_v11 }
 0x136   :  { %v136_v13 = vmul.f32 0.5, %v135_v12 }
 0x138   :  { %v137_v14 = vsub.f32 1.5, %v136_v13 }
 0x13a   :  { %v138_v15 = vmul.f32 %v245_v10, %v137_v14 }
 0x13c   :  { %v142_v19 = vsel %vm141_vm5, %v245_v10, %v138_v15 }
 0x13d   :  { %v144_v22 = vmul.f32 %v143_v16, %v142_v19 }
 0x13f   :  { %v166_v28 = vmul.f32 %v150_v17, %v144_v22  ;;  %v167_v29 = vmul.f32 %v151_v18, %v144_v22  ;;  %v168_v30 = vmul.f32 %v152_v20, %v144_v22  ;;  %v169_v31 = vmul.f32 %v153_v21, %v144_v22 }
 0x140   :  { %v170_v32 = vmul.f32 %v154_v23, %v144_v22  ;;  %v171_v33 = vmul.f32 %v155_v24, %v144_v22  ;;  %v172_v34 = vmul.f32 %v156_v26, %v144_v22  ;;  %v173_v35 = vmul.f32 %v157_v27, %v144_v22 }
 0x141   :  { %v175_v36 = vmul.f32 %v174_v25, %v144_v22 }
 0x143   :  { %v176_v39 = vadd.f32 %v175_v36, %v166_v28  ;;  %v177_v40 = vadd.f32 %v175_v36, %v167_v29  ;;  %v178_v41 = vadd.f32 %v175_v36, %v168_v30  ;;  %v179_v42 = vadd.f32 %v175_v36, %v169_v31 }
 0x144   :  { %v180_v43 = vadd.f32 %v175_v36, %v170_v32  ;;  %v181_v44 = vadd.f32 %v175_v36, %v171_v33  ;;  %v182_v45 = vadd.f32 %v175_v36, %v172_v34  ;;  %v183_v46 = vadd.f32 %v175_v36, %v173_v35 }
 0x145   :  { %v185_v47 = vmax.f32 %v184_v37, %v176_v39  ;;  %v186_v48 = vmax.f32 %v184_v37, %v177_v40  ;;  %v187_v49 = vmax.f32 %v184_v37, %v178_v41  ;;  %v188_v50 = vmax.f32 %v184_v37, %v179_v42 }
 0x146   :  { %v189_v51 = vmax.f32 %v184_v37, %v180_v43  ;;  %v190_v52 = vmax.f32 %v184_v37, %v181_v44  ;;  %v191_v53 = vmax.f32 %v184_v37, %v182_v45  ;;  %v192_v54 = vmax.f32 %v184_v37, %v183_v46 }
 0x147   :  { %v195_v55 = vmin.f32 %v193_v38, %v186_v48  ;;  %v196_v56 = vmin.f32 %v193_v38, %v187_v49  ;;  %v197_v57 = vmin.f32 %v193_v38, %v188_v50  ;;  %v194_v61 = vmin.f32 %v193_v38, %v185_v47 }
 0x148   :  { %v199_v58 = vmin.f32 %v193_v38, %v190_v52  ;;  %v200_v59 = vmin.f32 %v193_v38, %v191_v53  ;;  %v201_v60 = vmin.f32 %v193_v38, %v192_v54  ;;  %v198_v1 = vmin.f32 %v193_v38, %v189_v51 }
 0x149   :  { %v210_v62 = vrot.slane %v195_v55, 6  ;;  %v211_v63 = vrot.slane %v196_v56, 4  ;;  %v212_v0 = vrot.slane %v197_v57, 2 }
 0x14a   :  { %v213_v2 = vrot.slane %v199_v58, 6  ;;  %v214_v3 = vrot.slane %v200_v59, 4  ;;  %v215_v4 = vrot.slane %v201_v60, 2 }
 0x14b   :  { %v216_v5 = vsel %vm51_vm0, %v194_v61, %v210_v62  ;;  %v218_v6 = vsel %vm217_vm6, %v211_v63, %v212_v0 }
 0x14c   :  { %v220_v7 = vsel %vm219_vm7, %v216_v5, %v218_v6  ;;  %v221_v8 = vsel %vm51_vm0, %v198_v1, %v213_v2  ;;  %v222_v9 = vsel %vm217_vm6, %v214_v3, %v215_v4 }
 0x14d   :  { %v223_v10 = vsel %vm219_vm7, %v221_v8, %v222_v9  ;;  %226 = vst [vmem:[%s318_s2] sm:$0xff] %v220_v7 }
 0x14e   :  { %227 = vst [vmem:[%s318_s2 + $0x8] sm:$0xff] %v223_v10 }
 0x14f   :  { %232 = vsyncpa [#allocation3], 1 }

</bundles_post_ra>
